<compile_context>
chip_gen: v7x
topology: tpu7x:2x2x1
jax: 0.10.0
libtpu: 0.0.40
codegen_flags: <defaults>
</compile_context>

<pallas_src>
import functools
import math

import jax
import jax.numpy as jnp
from jax import lax
from jax.experimental import pallas as pl
from jax.experimental.pallas import tpu as pltpu

USE_CLAMP = True          # mirrors the module-level `use_clamp` flag in the PyTorch code
LANES = 128               # lane (minor) dimension of the flattened 2-D slab
MAX_BLOCK_ROWS = 1024     # (1024, 128) f32 block = 512 KiB per stream (keep <= this; see header)
SQRT2 = math.sqrt(2.0)

# Abramowitz & Stegun 7.1.26 rational approximation of erf, |error| <= 1.5e-7.
_ERF_P = 0.3275911
_ERF_A1 = 0.254829592
_ERF_A2 = -0.284496736
_ERF_A3 = 1.421413741
_ERF_A4 = -1.453152027
_ERF_A5 = 1.061405429


def _exact_recip(d):
    return 1.0 / d


def _approx_recip(d):
    # EUP approx reciprocal + one Newton step; error well below the 1.5e-7
    # erf-approximation error, moves the divide off the VALU (v7x win).
    y = pl.reciprocal(d, approx=True)
    return y * (2.0 - d * y)


def _erf(z, recip=_exact_recip):
    """erf built only from ops with guaranteed Mosaic lowerings (exp, +, *, recip)."""
    sgn = jnp.where(z < 0.0, -1.0, 1.0)
    a = jnp.abs(z)
    t = recip(1.0 + _ERF_P * a)
    poly = t * (_ERF_A1 + t * (_ERF_A2 + t * (_ERF_A3 + t * (_ERF_A4 + t * _ERF_A5))))
    return sgn * (1.0 - poly * jnp.exp(-(a * a)))


def _cdf_bits(x, mu, scale, q, recip=_exact_recip):
    """Shared math (kernel + tail + reference): -log2(clamped CDF(x+Q/2)-CDF(x-Q/2))."""
    scale = jnp.maximum(scale, 1e-9)                 # torch.clamp(scale, min=1e-9)
    inv = recip(scale * SQRT2)
    z0 = (x - mu) * inv
    dz = (0.5 * q) * inv                             # > 0, so upper >= lower (no abs needed)
    upper = _erf(z0 + dz, recip)
    lower = _erf(z0 - dz, recip)
    likelihood = jnp.maximum(0.5 * (upper - lower), 1e-6)   # Low_bound.apply (forward)
    return -jnp.log2(likelihood)


# ----------------------------------------------------------------------------
# Pallas kernel: elementwise Gaussian-CDF bits over (block_rows, 128) tiles.
# ----------------------------------------------------------------------------
def _bits_kernel(bounds_ref, x_ref, mean_ref, scale_ref, out_ref, *, q, use_clamp):
    x = x_ref[...].astype(jnp.float32)        # native-dtype load, cast in-kernel
    mu = mean_ref[...].astype(jnp.float32)
    sc = scale_ref[...].astype(jnp.float32)
    if use_clamp:
        lo = bounds_ref[0]                    # SMEM scalar: x_mean - 15000*Q
        hi = bounds_ref[1]                    # SMEM scalar: x_mean + 15000*Q
        x = jnp.minimum(jnp.maximum(x, lo), hi)
    out_ref[...] = _cdf_bits(x, mu, sc, q, recip=_approx_recip).astype(out_ref.dtype)


def _round_up(n, m):
    return ((n + m - 1) // m) * m


def _bits_2d(bounds, x2d, mean2d, scale2d, q, use_clamp, out_dtype):
    rows = x2d.shape[0]
    if rows < 16:
        block_rows = rows                     # full-extent block (always legal)
    else:
        # >= 2 grid steps so ("parallel",) can shard across v7x's two TensorCores;
        # sublane-aligned; capped at MAX_BLOCK_ROWS (VMEM budget, see header).
        block_rows = min(MAX_BLOCK_ROWS, _round_up(pl.cdiv(rows, 2), 8))
    grid = (pl.cdiv(rows, block_rows),)
    tile = pl.BlockSpec((block_rows, LANES), lambda i: (i, 0))
    bounds_spec = pl.BlockSpec(memory_space=pltpu.MemorySpace.SMEM)   # 2 scalars in SMEM
    kernel = functools.partial(_bits_kernel, q=float(q), use_clamp=bool(use_clamp))
    return pl.pallas_call(
        kernel,
        out_shape=jax.ShapeDtypeStruct((rows, LANES), out_dtype),
        grid=grid,
        in_specs=[bounds_spec, tile, tile, tile],
        out_specs=tile,
        compiler_params=pltpu.CompilerParams(dimension_semantics=("parallel",)),
    )(bounds, x2d, mean2d, scale2d)


# ----------------------------------------------------------------------------
# Wrapper: flatten (free reshape), kernel on the 128-aligned prefix,
# tiny plain-JAX epilogue for a ragged tail, unflatten.
# ----------------------------------------------------------------------------
def entropy_gaussian_clamp(x, mean, scale, Q=1.0, use_clamp=USE_CLAMP, out_dtype=None):
    """Pallas implementation of Entropy_gaussian_clamp.forward (NCHW in / out)."""
    orig_shape = x.shape
    total = x.size
    q = float(Q)
    if out_dtype is None:
        out_dtype = x.dtype if jnp.issubdtype(x.dtype, jnp.floating) else jnp.float32

    # Native-dtype flatten; contiguous reshape is free.  Casting happens in-kernel.
    xf = jnp.reshape(x, (-1,))
    mf = jnp.reshape(mean, (-1,))
    sf = jnp.reshape(scale, (-1,))

    if use_clamp:
        # x.mean(): a single scalar reduction — leave it to XLA.
        # TODO(synk): this is a second HBM pass over x; fuse into the producer's
        # epilogue if it shows up in profiles.
        x_mean = jnp.mean(xf, dtype=jnp.float32)
        lo = x_mean - 15000.0 * q
        hi = x_mean + 15000.0 * q
        bounds = jnp.stack([lo, hi]).astype(jnp.float32)
    else:
        bounds = jnp.zeros((2,), jnp.float32)

    main = (total // LANES) * LANES
    rows = main // LANES
    tail = total - main

    if rows > 0:
        x2d = xf[:main].reshape(rows, LANES)
        m2d = mf[:main].reshape(rows, LANES)
        s2d = sf[:main].reshape(rows, LANES)
        bits_main = _bits_2d(bounds, x2d, m2d, s2d, q, use_clamp, out_dtype).reshape(-1)
    else:
        bits_main = jnp.zeros((0,), out_dtype)

    if tail:
        # <128-element ragged tail: tiny plain-JAX epilogue with the same shared
        # math (exact reciprocal) — avoids a full-array pad copy of all inputs.
        xt = xf[main:].astype(jnp.float32)
        mt = mf[main:].astype(jnp.float32)
        st = sf[main:].astype(jnp.float32)
        if use_clamp:
            xt = jnp.clip(xt, bounds[0], bounds[1])
        bits_tail = _cdf_bits(xt, mt, st, q).astype(out_dtype)
        bits_flat = jnp.concatenate([bits_main, bits_tail])
    else:
        bits_flat = bits_main

    return bits_flat.reshape(orig_shape)


# ----------------------------------------------------------------------------
# Pure-JAX references (correctness check only).
# ----------------------------------------------------------------------------
def _clamp_like_torch(x, q, use_clamp):
    if use_clamp:
        xm = jnp.mean(x)
        x = jnp.clip(x, xm - 15000.0 * q, xm + 15000.0 * q)
    return x


def _reference_exact(x, mean, scale, Q=1.0, use_clamp=USE_CLAMP):
    """Exact reference: Normal CDF via lax.erf (mirrors the PyTorch module)."""
    x = x.astype(jnp.float32)
    mean = mean.astype(jnp.float32)
    scale = scale.astype(jnp.float32)
    q = float(Q)
    x = _clamp_like_torch(x, q, use_clamp)
    scale = jnp.maximum(scale, 1e-9)
    inv = 1.0 / (scale * SQRT2)
    lower = 0.5 * (1.0 + lax.erf((x - 0.5 * q - mean) * inv))
    upper = 0.5 * (1.0 + lax.erf((x + 0.5 * q - mean) * inv))
    return -jnp.log2(jnp.maximum(jnp.abs(upper - lower), 1e-6))


def _reference_shared(x, mean, scale, Q=1.0, use_clamp=USE_CLAMP):
    """Same formulation as the kernel (shared _cdf_bits / _erf, exact recip)."""
    x = x.astype(jnp.float32)
    mean = mean.astype(jnp.float32)
    scale = scale.astype(jnp.float32)
    q = float(Q)
    x = _clamp_like_torch(x, q, use_clamp)
    return _cdf_bits(x, mean, scale, q)


def _conditioning_tol(ref_bits, cdf_abs_err):
    # bits = -log2(L) with L clamped at 1e-6 is ill-conditioned near the floor:
    # allow the error induced by a `cdf_abs_err` absolute deviation in the CDF
    # difference, plus a small flat margin elsewhere.
    lk = jnp.exp2(-ref_bits)
    return 2e-3 + (cdf_abs_err / math.log(2.0)) / lk


def _check(x, mean, scale, Q=1.0):
    bits = entropy_gaussian_clamp(x, mean, scale, Q=Q)
    bits = jax.block_until_ready(bits)
    ref_shared = _reference_shared(x, mean, scale, Q=Q)
    ref_exact = _reference_exact(x, mean, scale, Q=Q)

    assert bits.shape == x.shape
    assert bool(jnp.all(jnp.isfinite(bits)))
    # (1) Kernel mechanics vs the identically-formulated JAX reference (only the
    #     approx-recip+Newton divide differs -> ~1e-7-level CDF deviation).
    assert bool(jnp.all(jnp.abs(bits - ref_shared) <= _conditioning_tol(ref_shared, 1.0e-6)))
    # (2) Semantics vs the exact (lax.erf) reference (adds the 1.5e-7 A&S error).
    assert bool(jnp.all(jnp.abs(bits - ref_exact) <= _conditioning_tol(ref_exact, 2.0e-6)))
    return bits


if __name__ == "__main__":
    key = jax.random.PRNGKey(0)
    k1, k2, k3, k4, k5, k6 = jax.random.split(key, 6)

    # Main case: NCHW, lane-aligned numel (no pad/tail path, grid of 2 blocks).
    N, C, H, W = 2, 4, 16, 16
    x = jax.random.normal(k1, (N, C, H, W), dtype=jnp.float32) * 3.0
    mean = jax.random.normal(k2, (N, C, H, W), dtype=jnp.float32)
    scale = jax.random.uniform(k3, (N, C, H, W), dtype=jnp.float32, minval=0.1, maxval=2.0)
    _check(x, mean, scale, Q=1.0)

    # Ragged case: exercises the aligned-prefix kernel + plain-JAX tail epilogue.
    shp = (1, 4, 10, 13)   # 520 elements -> 512 through the kernel, 8-element tail
    x2 = jax.random.normal(k4, shp, dtype=jnp.float32) * 3.0
    mean2 = jax.random.normal(k5, shp, dtype=jnp.float32)
    scale2 = jax.random.uniform(k6, shp, dtype=jnp.float32, minval=0.1, maxval=2.0)
    _check(x2, mean2, scale2, Q=1.0)

    print("KERNEL_OK")
</pallas_src>

<mosaic_0001>
module attributes {stable_mosaic.version = 11 : i64} {
  func.func @_bits_kernel(%arg0: i32, %arg1: memref<2xf32, #tpu.memory_space<smem>>, %arg2: memref<8x128xf32, #tpu.memory_space<vmem>>, %arg3: memref<8x128xf32, #tpu.memory_space<vmem>>, %arg4: memref<8x128xf32, #tpu.memory_space<vmem>>, %arg5: memref<8x128xf32, #tpu.memory_space<vmem>>) attributes {dimension_semantics = [#tpu.dimension_semantics<parallel>], iteration_bounds = array<i64: 2>, scalar_prefetch = 0 : i64, scratch_operands = 0 : i64, tpu.core_type = #tpu.core_type<tc>, window_params = [{transform_indices = @transform_0, window_bounds = array<i64: 2>}, {transform_indices = @transform_1, window_bounds = array<i64: 8, 128>}, {transform_indices = @transform_2, window_bounds = array<i64: 8, 128>}, {transform_indices = @transform_3, window_bounds = array<i64: 8, 128>}, {transform_indices = @transform_4, window_bounds = array<i64: 8, 128>}]} {
    %c0 = arith.constant 0 : index
    %c0_0 = arith.constant 0 : index
    %0 = vector.load %arg2[%c0, %c0_0] : memref<8x128xf32, #tpu.memory_space<vmem>>, vector<8x128xf32>
    %c0_1 = arith.constant 0 : index
    %c0_2 = arith.constant 0 : index
    %1 = vector.load %arg3[%c0_1, %c0_2] : memref<8x128xf32, #tpu.memory_space<vmem>>, vector<8x128xf32>
    %c0_3 = arith.constant 0 : index
    %c0_4 = arith.constant 0 : index
    %2 = vector.load %arg4[%c0_3, %c0_4] : memref<8x128xf32, #tpu.memory_space<vmem>>, vector<8x128xf32>
    %c0_5 = arith.constant 0 : index
    %3 = memref.load %arg1[%c0_5] : memref<2xf32, #tpu.memory_space<smem>>
    %c1 = arith.constant 1 : index
    %4 = memref.load %arg1[%c1] : memref<2xf32, #tpu.memory_space<smem>>
    %5 = vector.broadcast %3 : f32 to vector<8x128xf32>
    %6 = arith.maximumf %0, %5 : vector<8x128xf32>
    %7 = vector.broadcast %4 : f32 to vector<8x128xf32>
    %8 = arith.minimumf %6, %7 : vector<8x128xf32>
    %cst = arith.constant 9.99999971E-10 : f32
    %9 = vector.broadcast %cst : f32 to vector<8x128xf32>
    %10 = arith.maximumf %2, %9 : vector<8x128xf32>
    %cst_6 = arith.constant 1.41421354 : f32
    %11 = vector.broadcast %cst_6 : f32 to vector<8x128xf32>
    %12 = arith.mulf %10, %11 : vector<8x128xf32>
    %13 = tpu.reciprocal %12 {approx = true} : vector<8x128xf32> -> vector<8x128xf32>
    %14 = arith.mulf %12, %13 : vector<8x128xf32>
    %cst_7 = arith.constant 2.000000e+00 : f32
    %15 = vector.broadcast %cst_7 : f32 to vector<8x128xf32>
    %16 = arith.subf %15, %14 : vector<8x128xf32>
    %17 = arith.mulf %13, %16 : vector<8x128xf32>
    %18 = arith.subf %8, %1 : vector<8x128xf32>
    %19 = arith.mulf %18, %17 : vector<8x128xf32>
    %cst_8 = arith.constant 5.000000e-01 : f32
    %20 = vector.broadcast %cst_8 : f32 to vector<8x128xf32>
    %21 = arith.mulf %20, %17 : vector<8x128xf32>
    %22 = arith.addf %19, %21 : vector<8x128xf32>
    %cst_9 = arith.constant 0.000000e+00 : f32
    %23 = vector.broadcast %cst_9 : f32 to vector<8x128xf32>
    %24 = arith.cmpf olt, %22, %23 : vector<8x128xf32>
    %cst_10 = arith.constant -1.000000e+00 : f32
    %cst_11 = arith.constant 1.000000e+00 : f32
    %25 = vector.broadcast %cst_10 : f32 to vector<8x128xf32>
    %26 = vector.broadcast %cst_11 : f32 to vector<8x128xf32>
    %27 = arith.select %24, %25, %26 : vector<8x128xi1>, vector<8x128xf32>
    %28 = math.absf %22 : vector<8x128xf32>
    %cst_12 = arith.constant 0.327591091 : f32
    %29 = vector.broadcast %cst_12 : f32 to vector<8x128xf32>
    %30 = arith.mulf %29, %28 : vector<8x128xf32>
    %cst_13 = arith.constant 1.000000e+00 : f32
    %31 = vector.broadcast %cst_13 : f32 to vector<8x128xf32>
    %32 = arith.addf %31, %30 : vector<8x128xf32>
    %33 = tpu.reciprocal %32 {approx = true} : vector<8x128xf32> -> vector<8x128xf32>
    %34 = arith.mulf %32, %33 : vector<8x128xf32>
    %cst_14 = arith.constant 2.000000e+00 : f32
    %35 = vector.broadcast %cst_14 : f32 to vector<8x128xf32>
    %36 = arith.subf %35, %34 : vector<8x128xf32>
    %37 = arith.mulf %33, %36 : vector<8x128xf32>
    %cst_15 = arith.constant 1.06140542 : f32
    %38 = vector.broadcast %cst_15 : f32 to vector<8x128xf32>
    %39 = arith.mulf %37, %38 : vector<8x128xf32>
    %cst_16 = arith.constant -1.45315206 : f32
    %40 = vector.broadcast %cst_16 : f32 to vector<8x128xf32>
    %41 = arith.addf %40, %39 : vector<8x128xf32>
    %42 = arith.mulf %37, %41 : vector<8x128xf32>
    %cst_17 = arith.constant 1.42141378 : f32
    %43 = vector.broadcast %cst_17 : f32 to vector<8x128xf32>
    %44 = arith.addf %43, %42 : vector<8x128xf32>
    %45 = arith.mulf %37, %44 : vector<8x128xf32>
    %cst_18 = arith.constant -0.284496725 : f32
    %46 = vector.broadcast %cst_18 : f32 to vector<8x128xf32>
    %47 = arith.addf %46, %45 : vector<8x128xf32>
    %48 = arith.mulf %37, %47 : vector<8x128xf32>
    %cst_19 = arith.constant 0.254829586 : f32
    %49 = vector.broadcast %cst_19 : f32 to vector<8x128xf32>
    %50 = arith.addf %49, %48 : vector<8x128xf32>
    %51 = arith.mulf %37, %50 : vector<8x128xf32>
    %52 = arith.mulf %28, %28 : vector<8x128xf32>
    %cst_20 = arith.constant 0.000000e+00 : f32
    %53 = vector.broadcast %cst_20 : f32 to vector<8x128xf32>
    %54 = arith.subf %53, %52 : vector<8x128xf32>
    %55 = math.exp %54 : vector<8x128xf32>
    %56 = arith.mulf %51, %55 : vector<8x128xf32>
    %cst_21 = arith.constant 1.000000e+00 : f32
    %57 = vector.broadcast %cst_21 : f32 to vector<8x128xf32>
    %58 = arith.subf %57, %56 : vector<8x128xf32>
    %59 = arith.mulf %27, %58 : vector<8x128xf32>
    %60 = arith.subf %19, %21 : vector<8x128xf32>
    %cst_22 = arith.constant 0.000000e+00 : f32
    %61 = vector.broadcast %cst_22 : f32 to vector<8x128xf32>
    %62 = arith.cmpf olt, %60, %61 : vector<8x128xf32>
    %cst_23 = arith.constant -1.000000e+00 : f32
    %cst_24 = arith.constant 1.000000e+00 : f32
    %63 = vector.broadcast %cst_23 : f32 to vector<8x128xf32>
    %64 = vector.broadcast %cst_24 : f32 to vector<8x128xf32>
    %65 = arith.select %62, %63, %64 : vector<8x128xi1>, vector<8x128xf32>
    %66 = math.absf %60 : vector<8x128xf32>
    %cst_25 = arith.constant 0.327591091 : f32
    %67 = vector.broadcast %cst_25 : f32 to vector<8x128xf32>
    %68 = arith.mulf %67, %66 : vector<8x128xf32>
    %cst_26 = arith.constant 1.000000e+00 : f32
    %69 = vector.broadcast %cst_26 : f32 to vector<8x128xf32>
    %70 = arith.addf %69, %68 : vector<8x128xf32>
    %71 = tpu.reciprocal %70 {approx = true} : vector<8x128xf32> -> vector<8x128xf32>
    %72 = arith.mulf %70, %71 : vector<8x128xf32>
    %cst_27 = arith.constant 2.000000e+00 : f32
    %73 = vector.broadcast %cst_27 : f32 to vector<8x128xf32>
    %74 = arith.subf %73, %72 : vector<8x128xf32>
    %75 = arith.mulf %71, %74 : vector<8x128xf32>
    %cst_28 = arith.constant 1.06140542 : f32
    %76 = vector.broadcast %cst_28 : f32 to vector<8x128xf32>
    %77 = arith.mulf %75, %76 : vector<8x128xf32>
    %cst_29 = arith.constant -1.45315206 : f32
    %78 = vector.broadcast %cst_29 : f32 to vector<8x128xf32>
    %79 = arith.addf %78, %77 : vector<8x128xf32>
    %80 = arith.mulf %75, %79 : vector<8x128xf32>
    %cst_30 = arith.constant 1.42141378 : f32
    %81 = vector.broadcast %cst_30 : f32 to vector<8x128xf32>
    %82 = arith.addf %81, %80 : vector<8x128xf32>
    %83 = arith.mulf %75, %82 : vector<8x128xf32>
    %cst_31 = arith.constant -0.284496725 : f32
    %84 = vector.broadcast %cst_31 : f32 to vector<8x128xf32>
    %85 = arith.addf %84, %83 : vector<8x128xf32>
    %86 = arith.mulf %75, %85 : vector<8x128xf32>
    %cst_32 = arith.constant 0.254829586 : f32
    %87 = vector.broadcast %cst_32 : f32 to vector<8x128xf32>
    %88 = arith.addf %87, %86 : vector<8x128xf32>
    %89 = arith.mulf %75, %88 : vector<8x128xf32>
    %90 = arith.mulf %66, %66 : vector<8x128xf32>
    %cst_33 = arith.constant 0.000000e+00 : f32
    %91 = vector.broadcast %cst_33 : f32 to vector<8x128xf32>
    %92 = arith.subf %91, %90 : vector<8x128xf32>
    %93 = math.exp %92 : vector<8x128xf32>
    %94 = arith.mulf %89, %93 : vector<8x128xf32>
    %cst_34 = arith.constant 1.000000e+00 : f32
    %95 = vector.broadcast %cst_34 : f32 to vector<8x128xf32>
    %96 = arith.subf %95, %94 : vector<8x128xf32>
    %97 = arith.mulf %65, %96 : vector<8x128xf32>
    %98 = arith.subf %59, %97 : vector<8x128xf32>
    %cst_35 = arith.constant 5.000000e-01 : f32
    %99 = vector.broadcast %cst_35 : f32 to vector<8x128xf32>
    %100 = arith.mulf %99, %98 : vector<8x128xf32>
    %cst_36 = arith.constant 9.99999997E-7 : f32
    %101 = vector.broadcast %cst_36 : f32 to vector<8x128xf32>
    %102 = arith.maximumf %100, %101 : vector<8x128xf32>
    %103 = math.log %102 : vector<8x128xf32>
    %cst_37 = arith.constant 2.000000e+00 : f32
    %104 = math.log %cst_37 : f32
    %105 = vector.broadcast %104 : f32 to vector<8x128xf32>
    %106 = arith.divf %103, %105 : vector<8x128xf32>
    %cst_38 = arith.constant 0.000000e+00 : f32
    %107 = vector.broadcast %cst_38 : f32 to vector<8x128xf32>
    %108 = arith.subf %107, %106 : vector<8x128xf32>
    %c0_39 = arith.constant 0 : index
    %c0_40 = arith.constant 0 : index
    %109 = vector.load %arg5[%c0_39, %c0_40] : memref<8x128xf32, #tpu.memory_space<vmem>>, vector<8x128xf32>
    tpu.vector_store %arg5[%c0_39, %c0_40], %108 {strides = array<i32>} : memref<8x128xf32, #tpu.memory_space<vmem>>, vector<8x128xf32>,
    return
  }
  func.func @transform_0(%arg0: i32) -> i32 {
    %c0_i32 = arith.constant 0 : i32
    %c0_i32_0 = arith.constant 0 : i32
    return %c0_i32 : i32
  }
  func.func @transform_1(%arg0: i32) -> (i32, i32) {
    %c0_i32 = arith.constant 0 : i32
    %c0_i32_0 = arith.constant 0 : i32
    return %arg0, %c0_i32 : i32, i32
  }
  func.func @transform_2(%arg0: i32) -> (i32, i32) {
    %c0_i32 = arith.constant 0 : i32
    %c0_i32_0 = arith.constant 0 : i32
    return %arg0, %c0_i32 : i32, i32
  }
  func.func @transform_3(%arg0: i32) -> (i32, i32) {
    %c0_i32 = arith.constant 0 : i32
    %c0_i32_0 = arith.constant 0 : i32
    return %arg0, %c0_i32 : i32, i32
  }
  func.func @transform_4(%arg0: i32) -> (i32, i32) {
    %c0_i32 = arith.constant 0 : i32
    %c0_i32_0 = arith.constant 0 : i32
    return %arg0, %c0_i32 : i32, i32
  }
}

</mosaic_0001>

<bundles_post_ra>
// kernel: tpu_custom_call.1
= control target key start
LH: loop header
LB: loop body
LE: loop exit
PB: predicated region body
PF: predicated region fallthrough
CT: control target
= control target key end

     0   :  { %s1103_s0 = inlined_call_operand.hbm [shape: f32[2], index: 0, kind: input, shape index: {}]   ;;  %s1104_s1 = inlined_call_operand.hbm [shape: f32[16,128], index: 1, kind: input, shape index: {}]   ;;  %s1105_s2 = inlined_call_operand.hbm [shape: f32[16,128], index: 2, kind: input, shape index: {}]   ;;  %s1106_s3 = inlined_call_operand.hbm [shape: f32[16,128], index: 3, kind: input, shape index: {}]   ;;  %s1107_s4 = inlined_call_operand.hbm [shape: f32[16,128], index: 4, kind: output, shape index: {}]  }
   0x1   :  { %1116 = sst [smem:[#allocation16_spill]] %s1105_s2 }
   0x2   :  { %9 = vsyncpa [#allocation5], 0 }
   0x3   :  { %10 = vsyncpa [#allocation3], 0 }
   0x4   :  { %12 = vsyncpa [#allocation3 + $0x1], 0 }
   0x5   :  { %13 = vsyncpa [#allocation8], 0 }
   0x6   :  { %15 = vsyncpa [#allocation8 + $0x1], 0 }
   0x7   :  { %16 = vsyncpa [#allocation4], 0 }
   0x8   :  { %18 = vsyncpa [#allocation4 + $0x1], 0  ;;  %s825_s15 = smov 0   ;;  %s827_s16 = smov 0  }
   0x9   :  { %s829_s17 = smov 0   ;;  %s831_s18 = smov 0  }
   0xa LB: > { %s846_s19 = sadd.s32 1, %s792_s18   ;;  %s52_s20 = sadd.s32 1, %s788_s17  ;;  %s792_s18 = sphi %s831_s18, %s1142_s18   ;;  %s788_s17 = sphi %s829_s17, %s1141_s17   ;;  %s784_s16 = sphi %s827_s16, %s1140_s16   ;;  %s780_s15 = sphi %s825_s15, %s1139_s15  }
   0xb   : > { %s49_s21 = ssub.s32 %s792_s18, %s846_s19  ;;  %p1108_p0 = scmp.ne.s32.totalorder %s788_s17, %s784_s16 }
   0xc   : > { %p50_p1 = scmp.eq.s32.totalorder %s49_s21, 0  ;;  %p60_p2 = scmp.eq.s32.totalorder %s792_s18, 0 }
   0xd   : > { %p566_p4 = scmp.lt.s32.totalorder %s792_s18, 2  ;;  %s176_s23 = sand.u32 1, %s788_s17  }
   0xe   : > { %s857_s22 = scalar_select %p50_p1, %s788_s17, %s52_s20  }
   0xf   : > { %p61_p5 = por %p60_p2, %p1108_p0  ;;  %s865_s24 = sshll.u32 %s176_s23, 3 }
  0x10   : > { %1117 = sst [smem:[#allocation15_spill]] %s857_s22  ;;  %s868_s25 = sshll.u32 %s792_s18, 7 }
  0x11   : > { %p870_p6 = pnand %p566_p4, %p61_p5  ;;  %s194_s27 = sand.u32 1, %s792_s18  }
  0x12   : > { %s1119_s2 = sld [smem:[#allocation16_spill]]  ;;  %s198_s5 = scalar_lea.vmem [#allocation7], %s865_s24 }
  0x13   : > { %s1118_s26 = scalar_select %p870_p6, 1, 0 }
  0x14   : > { %s205_s6 = sshll.u32 %s198_s5, 4  ;;  %s884_s7 = scalar_lea.sflag [#allocation8], %s194_s27  ;;  %s882_s6 = int_to_ptr.vmem [resolvable:$true] %s205_s6 }
  0x15   : > { %p890_p8 = pneg %p870_p6 }
  0x18   : > { %s879_s30 = scalar_lea.hbm %s1119_s2, %s868_s25  ;;  %s620_s12 = scalar_lea.hbm %s1119_s2, 256 }
  0x19   : > { %s615_s8 = scalar_lea.hbm %s879_s30, 128  ;;  %p621_p11 = scmp.lt.u32.totalorder %s879_s30, %s1119_s2 }
  0x1a   : > { %p616_p7 = scmp.ne.s32.totalorder %s879_s30, %s615_s8  ;;  %p622_p12 = scmp.lt.u32.totalorder %s620_s12, %s615_s8 }
  0x1b   : > { %p624_p1 = scmp.lt.u32.totalorder %s615_s8, %s879_s30 }
  0x1c   : > { %p618_p9 = pnand %p890_p8, %p616_p7  ;;  %p623_p13 = por %p622_p12, %p621_p11 }
  0x1e   : > { %p619_p10 = pneg %p618_p9  ;;  %p625_p2 = por %p624_p1, %p623_p13 }
  0x20   : > { %p626_p4 = pnand %p625_p2, %p619_p10 }
  0x22   : > { %629 = shalt.err (!%p626_p4)
}
  0x23   : > { %s630_s20 = scalar_lea.vmem %s882_s6, 128  ;;  %s794_s21 = smov [#allocation7]  }
  0x24   : > { %p631_p5 = scmp.ne.s32.totalorder %s882_s6, %s630_s20  ;;  %s635_s27 = sshll.u32 %s794_s21, 4  ;;  %s636_s27 = int_to_ptr.vmem [resolvable:$false] %s635_s27 }
  0x25   : > { %s637_s28 = scalar_lea.vmem %s636_s27, 256  ;;  %p638_p3 = scmp.lt.s32.totalorder %s882_s6, %s636_s27 }
  0x26   : > { %p633_p7 = pnand %p631_p5, %p890_p8  ;;  %p639_p0 = scmp.lt.s32.totalorder %s637_s28, %s630_s20 }
  0x28   : > { %p634_p9 = pneg %p633_p7  ;;  %p640_p11 = por %p639_p0, %p638_p3 }
  0x2a   : > { %p641_p12 = pnand %p640_p11, %p634_p9 }
  0x2c   : > { %644 = shalt.err (!%p641_p12)
}
  0x2d   : > { %557 = dma.hbm_to_vmem [thread:$0]  (!%p870_p6), %s879_s30, 128, %s882_s6, %s884_s7  }
  0x2e   : > { %s915_s29 = sadd.s32 4294967295, %s792_s18   ;;  %s514_s5 = sadd.s32 4294967294, %s792_s18  }
  0x2f   : > { %p65_p0 = scmp.ne.s32.totalorder %s784_s16, %s780_s15  ;;  %p1109_p3 = scmp.eq.s32.totalorder %s915_s29, 0 }
  0x30   : > { %p141_p10 = scmp.eq.s32.totalorder %s915_s29, 1  ;;  %p147_p13 = scmp.eq.s32.totalorder %s514_s5, 1 }
  0x31   : > { %p924_p1 = por %p1109_p3, %p65_p0  ;;  %p515_p2 = scmp.ge.s32.totalorder %s792_s18, 1 }
  0x32   : > { %p1122_p4 = scmp.ne.s32.totalorder %s788_s17, %s784_s16  ;;  %p936_p7 = por %p147_p13, %p65_p0 }
  0x33   : > { %s1121_s8 = scalar_select %p924_p1, 1, 0 }
  0x34   : > { %p932_p5 = por %p141_p10, %p1122_p4  ;;  %p154_p9 = scmp.lt.s32.totalorder %s792_s18, 3 }
  0x35   : > { %s1124_s6 = scalar_select %p936_p7, 1, 0 }
  0x36   : > { %s1123_s30 = scalar_select %p932_p5, 1, 0 }
  0x37   : > { %p941_p11 = pnand %p515_p2, %p154_p9  ;;  %s949_s13 = scalar_lea.hbm %s1104_s1, %s868_s25 }
  0x38   : > { %s180_s14 = scalar_lea.vmem [#allocation6], %s865_s24  ;;  %s177_s21 = scalar_lea.sflag [#allocation3], %s176_s23 }
  0x39   : > { %s1125_s10 = scalar_select %p941_p11, 1, 0 }
  0x3a   : > { %s187_s20 = sshll.u32 %s180_s14, 4  ;;  %s645_s27 = scalar_lea.hbm %s949_s13, 128  ;;  %s188_s20 = int_to_ptr.vmem [resolvable:$true] %s187_s20 }
  0x3b   : > { %p646_p0 = scmp.ne.s32.totalorder %s949_s13, %s645_s27  ;;  %s650_s11 = scalar_lea.hbm %s1104_s1, 256 }
  0x3c   : > { %p651_p2 = scmp.lt.u32.totalorder %s949_s13, %s1104_s1  ;;  %p652_p4 = scmp.lt.u32.totalorder %s650_s11, %s645_s27 }
  0x3d   : > { %p648_p10 = pnand %p646_p0, %p890_p8  ;;  %p654_p3 = scmp.lt.u32.totalorder %s645_s27, %s949_s13 }
  0x3e   : > { %p653_p9 = por %p652_p4, %p651_p2 }
  0x3f   : > { %p649_p13 = pneg %p648_p10 }
  0x40   : > { %p655_p12 = por %p654_p3, %p653_p9 }
  0x42   : > { %p656_p7 = pnand %p655_p12, %p649_p13 }
  0x44   : > { %659 = shalt.err (!%p656_p7)
}
  0x45   : > { %s660_s23 = scalar_lea.vmem %s188_s20, 128  ;;  %s795_s14 = smov [#allocation6]  }
  0x46   : > { %p661_p5 = scmp.ne.s32.totalorder %s188_s20, %s660_s23  ;;  %s665_s22 = sshll.u32 %s795_s14, 4  ;;  %s666_s22 = int_to_ptr.vmem [resolvable:$false] %s665_s22 }
  0x47   : > { %s667_s28 = scalar_lea.vmem %s666_s22, 256  ;;  %p668_p1 = scmp.lt.s32.totalorder %s188_s20, %s666_s22 }
  0x48   : > { %p663_p0 = pnand %p661_p5, %p890_p8  ;;  %p669_p11 = scmp.lt.s32.totalorder %s667_s28, %s660_s23 }
  0x4a   : > { %p664_p10 = pneg %p663_p0  ;;  %p670_p6 = por %p669_p11, %p668_p1 }
  0x4c   : > { %p671_p2 = pnand %p670_p6, %p664_p10 }
  0x4e   : > { %674 = shalt.err (!%p671_p2)
}
  0x4f   : > { %p1126_p4 = scmp.ne.s32.totalorder %s1118_s26, 0  ;;  %p1127_p3 = scmp.eq.s32.totalorder %s915_s29, 0 }
  0x50   : > { %p1128_p5 = scmp.ne.s32.totalorder %s1125_s10, 0  ;;  %s986_s5 = scalar_lea.hbm %s1106_s3, %s868_s25 }
  0x51   : > { %554 = dma.hbm_to_vmem [thread:$0]  (!%p1126_p4), %s949_s13, 128, %s188_s20, %s177_s21  }
  0x52   : > { %p1129_p7 = pneg %p1128_p5  ;;  %s216_s11 = scalar_lea.vmem [#allocation9], %s865_s24 }
  0x53   : > { %s223_s12 = sshll.u32 %s216_s11, 4  ;;  %s675_s13 = scalar_lea.hbm %s1103_s0, 16  ;;  %s989_s12 = int_to_ptr.vmem [resolvable:$true] %s223_s12 }
  0x54   : > { %p978_p12 = pnand %p1129_p7, %p1127_p3  ;;  %p676_p6 = scmp.ne.s32.totalorder %s1103_s0, %s675_s13 }
  0x55   : > { %p682_p9 = scmp.lt.u32.totalorder %s675_s13, %s1103_s0 }
  0x56   : > { %p677_p1 = pneg %p978_p12 }
  0x58   : > { %p678_p11 = pnand %p677_p1, %p676_p6 }
  0x5a   : > { %p679_p13 = pneg %p678_p11 }
  0x5c   : > { %p684_p0 = pnand %p682_p9, %p679_p13 }
  0x5e   : > { %687 = shalt.err (!%p684_p0)
}
  0x5f   : > { %s796_s24 = smov [#allocation2]   ;;  %s688_s11 = scalar_lea.hbm %s986_s5, 128 }
  0x60   : > { %550 = dma.hbm_to_smem (!%p978_p12), %s1103_s0, 16, %s796_s24, [#allocation5]  }
  0x61   : > { %p689_p10 = scmp.ne.s32.totalorder %s986_s5, %s688_s11  ;;  %s693_s13 = scalar_lea.hbm %s1106_s3, 256 }
  0x62   : > { %p694_p7 = scmp.lt.u32.totalorder %s986_s5, %s1106_s3  ;;  %p695_p6 = scmp.lt.u32.totalorder %s693_s13, %s688_s11 }
  0x63   : > { %p691_p2 = pnand %p689_p10, %p890_p8  ;;  %p697_p11 = scmp.lt.u32.totalorder %s688_s11, %s986_s5 }
  0x64   : > { %p696_p1 = por %p695_p6, %p694_p7 }
  0x65   : > { %p692_p3 = pneg %p691_p2 }
  0x66   : > { %p698_p13 = por %p697_p11, %p696_p1 }
  0x68   : > { %p699_p9 = pnand %p698_p13, %p692_p3 }
  0x6a   : > { %702 = shalt.err (!%p699_p9)
}
  0x6b   : > { %s703_s21 = scalar_lea.vmem %s989_s12, 128  ;;  %s797_s28 = smov [#allocation9]  }
  0x6c   : > { %p704_p12 = scmp.ne.s32.totalorder %s989_s12, %s703_s21  ;;  %s708_s22 = sshll.u32 %s797_s28, 4  ;;  %s709_s22 = int_to_ptr.vmem [resolvable:$false] %s708_s22 }
  0x6d   : > { %s710_s24 = scalar_lea.vmem %s709_s22, 256  ;;  %p711_p2 = scmp.lt.s32.totalorder %s989_s12, %s709_s22 }
  0x6e   : > { %p706_p0 = pnand %p704_p12, %p890_p8  ;;  %p712_p5 = scmp.lt.s32.totalorder %s710_s24, %s703_s21 }
  0x70   : > { %p707_p10 = pneg %p706_p0  ;;  %p713_p7 = por %p712_p5, %p711_p2 }
  0x72   : > { %p714_p6 = pnand %p713_p7, %p707_p10 }
  0x74   : > { %717 = shalt.err (!%p714_p6)
}
  0x75   : > { %560 = dma.hbm_to_vmem [thread:$0]  (!%p1126_p4), %s986_s5, 128, %s989_s12, %s884_s7  }
  0x76   : > { %p1131_p3 = scmp.ne.s32.totalorder %s1125_s10, 0 }
  0x77   : > { %p1132_p8 = scmp.eq.s32.totalorder (!%p1131_p3), %s915_s29, 0 }
  0x78   : > { %232 = sbr.rel (%p1131_p3) target bundleno = 248 (0xf8), region = 36 }
  0x7f   : > { %763 = dma.done.wait (%p1132_p8), [#allocation5], 16   ;;  %p1133_p1 = pmov %p1132_p8 }
  0x80   : > { %s1036_s9 = sand.u32 1, %s784_s16   ;;  %p1134_p4 = scmp.ne.s32.totalorder %s1121_s8, 0 }
  0x81   : > { %765 = vsyncadd (%p1133_p1), [#allocation5], 4294967280  ;;  %s1039_s26 = sshll.u32 %s1036_s9, 3  ;;  %s239_s25 = scalar_lea.sflag [#allocation3], %s1036_s9 }
  0x82   : > { %s242_s7 = scalar_lea.vmem [#allocation6], %s1039_s26 }
  0x83   : > { %767 = dma.done.wait (%p1134_p4), %s239_s25, 128  }
  0x84   : > { %769 = vsyncadd (%p1134_p4), %s239_s25, 4294967168  ;;  %s247_s10 = sand.u32 1, %s915_s29   ;;  %s251_s12 = scalar_lea.vmem [#allocation7], %s1039_s26 }
  0x85   : > { %s248_s5 = scalar_lea.sflag [#allocation8], %s247_s10 }
  0x86   : > { %771 = dma.done.wait (%p1134_p4), %s248_s5, 256  }
  0x87   : > { %773 = vsyncadd (%p1134_p4), %s248_s5, 4294967040  ;;  %s260_s27 = scalar_lea.vmem [#allocation9], %s1039_s26 }
  0x88   : > { %265 = sfence }
  0x89   : > { %v298_v0 = vld [vmem:[%s260_s27] sm:$0xff]  ;;  %s299_s11 = sld [smem:[#allocation2]]  ;;  %s530_s23 = sld [smem:[#allocation2 + $0x1]]  ;;  %v297_v9 = vld [vmem:[%s251_s12] sm:$0xff]  ;;  %v798_v59 = vmov 1.0  }
  0x8a   : > { %v305_v1 = vmax.f32 %v298_v0, 1e-09  ;;  %v296_v3 = vld [vmem:[%s242_s7] sm:$0xff]  ;;  %s295_s8 = scalar_lea.vmem [#allocation10], %s1039_s26  ;;  %s532_s13 = sshll.u32 %s915_s29, 7 }
  0x8b   : > { %s389_s14 = sshll.u32 %s295_s8, 4  ;;  %s1061_s21 = scalar_lea.hbm %s1107_s4, %s532_s13  ;;  %s1056_s14 = int_to_ptr.vmem [resolvable:$true] %s389_s14 }
  0x8c   : > { %v306_v2 = vmul.f32 1.4142135, %v305_v1  ;;  %s376_s28 = scalar_lea.sflag [#allocation4], %s1036_s9  ;;  %s718_s22 = scalar_lea.vmem %s1056_s14, 128 }
  0x8d   : > { %p719_p5 = scmp.ne.s32.totalorder %s1056_s14, %s718_s22  ;;  %p1135_p11 = scmp.ne.s32.totalorder %s1123_s30, 0 }
  0x8e   : > { %603 = vrcp.f32 %v306_v2  ;;  %s799_s29 = smov [#allocation10]  }
  0x8f   : > { %v301_v4 = vstv %s299_s11  ;;  %v303_v6 = vstv %s530_s23  ;;  %p720_p13 = pnand %p719_p5, %p1135_p11  ;;  %s722_s24 = sshll.u32 %s799_s29, 4  ;;  %s723_s24 = int_to_ptr.vmem [resolvable:$false] %s722_s24 }
  0x90   : > { %v302_v5 = vmax.f32 %v296_v3, %v301_v4  ;;  %s724_s26 = scalar_lea.vmem %s723_s24, 256  ;;  %p725_p12 = scmp.lt.s32.totalorder %s1056_s14, %s723_s24 }
  0x91   : > { %p721_p9 = pneg %p720_p13  ;;  %p726_p0 = scmp.lt.s32.totalorder %s724_s26, %s718_s22 }
  0x92   : > { %v304_v7 = vmin.f32 %v302_v5, %v303_v6 }
  0x93   : > { %p727_p10 = por %p726_p0, %p725_p12 }
  0x94   : > { %v311_v12 = vsub.f32 %v304_v7, %v297_v9 }
  0x95   : > { %p728_p2 = pnand %p727_p10, %p721_p9 }
  0x98   : > { %v604_v8 = vpop.eup %603 }
  0x99   : > { %v308_v10 = vmul.f32 %v604_v8, %v306_v2 }
  0x9b   : > { %v309_v11 = vsub.f32 2.0, %v308_v10 }
  0x9d   : > { %v310_v13 = vmul.f32 %v604_v8, %v309_v11 }
  0x9f   : > { %v312_v14 = vmul.f32 %v311_v12, %v310_v13  ;;  %v313_v15 = vmul.f32 0.5, %v310_v13 }
  0xa1   : > { %v314_v16 = vadd.f32 %v313_v15, %v312_v14  ;;  %v340_v17 = vsub.f32 %v312_v14, %v313_v15 }
  0xa3   : > { %v317_v18 = vand.u32 2147483647, %v314_v16  ;;  %v343_v19 = vand.u32 2147483647, %v340_v17  ;;  %vm315_vm0 = vcmp.lt.f32.partialorder %v314_v16, 0.0  ;;  %vm341_vm1 = vcmp.lt.f32.partialorder %v340_v17, 0.0 }
  0xa4   : > { %v316_v60 = vsel %vm315_vm0, -1.0, %v798_v59  ;;  %v342_v63 = vsel %vm341_vm1, -1.0, %v798_v59 }
  0xa5   : > { %v318_v20 = vmul.f32 0.3275911, %v317_v18  ;;  %v344_v21 = vmul.f32 0.3275911, %v343_v19  ;;  %v333_v25 = vmul.f32 %v317_v18, %v317_v18  ;;  %v359_v28 = vmul.f32 %v343_v19, %v343_v19 }
  0xa7   : > { %v319_v22 = vadd.f32 1.0, %v318_v20  ;;  %v345_v23 = vadd.f32 1.0, %v344_v21  ;;  %v334_v31 = vsub.f32 0.0, %v333_v25  ;;  %v360_v34 = vsub.f32 0.0, %v359_v28 }
  0xa9   : > { %605 = vrcp.f32 %v319_v22  ;;  %v335_v37 = vmul.f32 1.442695, %v334_v31  ;;  %v361_v40 = vmul.f32 1.442695, %v360_v34 }
  0xaa   : > { %607 = vrcp.f32 %v345_v23 }
  0xab   : > { %609 = vpow2.f32 %v335_v37 }
  0xac   : > { %611 = vpow2.f32 %v361_v40 }
  0xb3   : > { %v606_v24 = vpop.eup %605 }
  0xb4   : > { %v608_v26 = vpop.eup %607  ;;  %v321_v27 = vmul.f32 %v606_v24, %v319_v22 }
  0xb5   : > { %v347_v29 = vmul.f32 %v608_v26, %v345_v23  ;;  %v610_v53 = vpop.eup %609 }
  0xb6   : > { %v322_v30 = vsub.f32 2.0, %v321_v27  ;;  %v612_v55 = vpop.eup %611 }
  0xb7   : > { %v348_v32 = vsub.f32 2.0, %v347_v29 }
  0xb8   : > { %v323_v33 = vmul.f32 %v606_v24, %v322_v30 }
  0xb9   : > { %v349_v35 = vmul.f32 %v608_v26, %v348_v32 }
  0xba   : > { %v324_v36 = vmul.f32 1.0614054, %v323_v33 }
  0xbb   : > { %v350_v38 = vmul.f32 1.0614054, %v349_v35 }
  0xbc   : > { %v325_v39 = vadd.f32 -1.4531521, %v324_v36 }
  0xbd   : > { %v351_v41 = vadd.f32 -1.4531521, %v350_v38 }
  0xbe   : > { %v326_v42 = vmul.f32 %v325_v39, %v323_v33 }
  0xbf   : > { %v352_v43 = vmul.f32 %v351_v41, %v349_v35 }
  0xc0   : > { %v327_v44 = vadd.f32 1.4214138, %v326_v42 }
  0xc1   : > { %v353_v45 = vadd.f32 1.4214138, %v352_v43 }
  0xc2   : > { %v328_v46 = vmul.f32 %v327_v44, %v323_v33 }
  0xc3   : > { %v354_v47 = vmul.f32 %v353_v45, %v349_v35 }
  0xc4   : > { %v329_v48 = vadd.f32 -0.28449672, %v328_v46 }
  0xc5   : > { %v355_v49 = vadd.f32 -0.28449672, %v354_v47 }
  0xc6   : > { %v330_v50 = vmul.f32 %v329_v48, %v323_v33 }
  0xc7   : > { %v356_v51 = vmul.f32 %v355_v49, %v349_v35 }
  0xc8   : > { %v331_v52 = vadd.f32 0.2548296, %v330_v50 }
  0xc9   : > { %v357_v54 = vadd.f32 0.2548296, %v356_v51 }
  0xca   : > { %v332_v56 = vmul.f32 %v331_v52, %v323_v33 }
  0xcb   : > { %v358_v57 = vmul.f32 %v357_v54, %v349_v35 }
  0xcc   : > { %v337_v58 = vmul.f32 %v610_v53, %v332_v56 }
  0xcd   : > { %v363_v61 = vmul.f32 %v612_v55, %v358_v57 }
  0xce   : > { %v338_v62 = vsub.f32 1.0, %v337_v58 }
  0xcf   : > { %v364_v0 = vsub.f32 1.0, %v363_v61 }
  0xd0   : > { %v339_v1 = vmul.f32 %v338_v62, %v316_v60 }
  0xd1   : > { %v365_v2 = vmul.f32 %v364_v0, %v342_v63 }
  0xd3   : > { %v366_v3 = vsub.f32 %v339_v1, %v365_v2 }
  0xd5   : > { %v367_v4 = vmul.f32 0.5, %v366_v3 }
  0xd7   : > { %v368_v5 = vmax.f32 %v367_v4, 1e-06 }
  0xd9   : > { %613 = vlog2.f32 %v368_v5 }
  0xe3   : > { %v614_v6 = vpop.eup %613 }
  0xe4   : > { %v370_v7 = vmul.f32 0.6931472, %v614_v6 }
  0xe6   : > { %v372_v8 = vmul.f32 1.442695, %v370_v7 }
  0xe8   : > { %v373_v9 = vsub.f32 0.0, %v372_v8 }
  0xea   : > { %374 = vst [vmem:[%s295_s8] sm:$0xff] %v373_v9 }
  0xeb   : > { %731 = shalt.err (!%p728_p2)
}
  0xec   : > { %s732_s9 = scalar_lea.hbm %s1061_s21, 128  ;;  %s736_s10 = scalar_lea.hbm %s1107_s4, 256 }
  0xed   : > { %p733_p7 = scmp.ne.s32.totalorder %s1061_s21, %s732_s9  ;;  %p737_p8 = scmp.lt.u32.totalorder %s1061_s21, %s1107_s4 }
  0xee   : > { %p738_p1 = scmp.lt.u32.totalorder %s736_s10, %s732_s9  ;;  %p740_p5 = scmp.lt.u32.totalorder %s732_s9, %s1061_s21 }
  0xef   : > { %p734_p6 = pnand %p733_p7, %p1135_p11 }
  0xf0   : > { %p739_p4 = por %p738_p1, %p737_p8 }
  0xf1   : > { %p735_p3 = pneg %p734_p6 }
  0xf2   : > { %p741_p13 = por %p740_p5, %p739_p4 }
  0xf4   : > { %p742_p9 = pnand %p741_p13, %p735_p3 }
  0xf6   : > { %745 = shalt.err (!%p742_p9)
}
  0xf7   : > { %545 = dma.vmem_to_hbm [thread:$0]  (%p1135_p11), %s1056_s14, 128, %s1061_s21, %s376_s28  }
  0xf8 PF: > { %s401_s27 = sand.u32 1, %s780_s15   ;;  %p1136_p12 = scmp.ne.s32.totalorder %s1124_s6, 0 }
  0xf9   : > { %p1137_p0 = scmp.ge.s32.totalorder %s792_s18, 2  ;;  %s402_s11 = scalar_lea.sflag [#allocation4], %s401_s27 }
  0xfb   : > { %p562_p10 = pnand %p1137_p0, %p1136_p12 }
  0xfd   : > { %775 = dma.done.wait (!%p562_p10), %s402_s11, 128  }
  0xfe   : > { %777 = vsyncadd (!%p562_p10), %s402_s11, 4294967168  ;;  %s1138_s23 = sld [smem:[#allocation15_spill]]  ;;  %p21_p2 = scmp.ge.s32.totalorder %s846_s19, 4  }
  0xff   : > { %s1139_s15 = smov %s784_s16  ;;  %s1140_s16 = smov %s788_s17 }
 0x100   : > { %s1142_s18 = smov %s846_s19  ;;  %23 = sbr.rel (!%p21_p2) target bundleno = 10 (0xa), region = 110 }
 0x104   : > { %s1141_s17 = smov %s1138_s23 }
 0x107   :  { %407 = vsyncpa [#allocation3], 1 }
 0x108   :  { %409 = vsyncpa [#allocation3 + $0x1], 1 }
 0x109   :  { %410 = vsyncpa [#allocation8], 1 }
 0x10a   :  { %412 = vsyncpa [#allocation8 + $0x1], 1 }
 0x10b   :  { %413 = vsyncpa [#allocation4], 1 }
 0x10c   :  { %415 = vsyncpa [#allocation4 + $0x1], 1 }
 0x10d   :  { %416 = vsyncpa [#allocation5], 1 }
 0x10e   :  { %418 = vsyncpa [#allocation5 + $0x1], 1 }

</bundles_post_ra>
